<compile_context>
chip_gen: v7x
topology: tpu7x:2x2x1
jax: 0.10.0
libtpu: 0.0.40
codegen_flags: <defaults>
</compile_context>

<pallas_src>
import functools
from typing import NamedTuple

import jax
import jax.numpy as jnp
from jax.experimental import pallas as pl
from jax.experimental.pallas import tpu as pltpu


class CAMeta(NamedTuple):
    E: int
    Ep: int
    H: int
    D: int
    cd_name: str


def _round_up(x: int, m: int) -> int:
    return (x + m - 1) // m * m


def _vmem_budget_bytes() -> int:
    """Generation-aware per-core VMEM budget (~48 MiB on v7x, ~104 MiB on v5e/v6e)."""
    try:
        cap = int(pltpu.get_tpu_info().vmem_capacity_bytes)
        if cap <= 0:
            raise ValueError
    except Exception:
        cap = 64 * 1024 * 1024
    return max(3 * cap // 4, cap - 24 * 1024 * 1024)


def _pick_tile_n(N: int, Ep: int, H: int, D: int,
                 in_bytes: int, cd_bytes: int, out_bytes: int):
    """Row-tile size TN and VMEM limit. Big tiles amortize per-step overhead; we keep
    >=2 grid steps when there is enough work (v7x megacore) and prefer a tile dividing N
    so no pad copy of the streamed inputs is needed."""
    budget = _vmem_budget_bytes()

    # Resident (constant index_map, single-buffered via pl.Buffered(1)) operands.
    resident = (3 * Ep * Ep + Ep * D + 2 * Ep * H + D * Ep) * cd_bytes + 4 * Ep * 4
    # Per-row: 2 streamed inputs double-buffered (native dtype), output double-buffered,
    # plus ~10 live f32 intermediates of width Ep.
    per_row = 2 * 2 * Ep * in_bytes + 2 * Ep * out_bytes + 10 * Ep * 4

    avail = max(budget - resident, 1 << 20)
    tn = max(16, avail // per_row)
    tn = (tn // 128 * 128) if tn >= 256 else (tn // 16 * 16)

    n16 = _round_up(N, 16)
    tn = min(tn, n16)
    if n16 >= 32:                       # guarantee >= 2 grid steps when it matters
        tn = min(tn, _round_up((n16 + 1) // 2, 16))
    tn = max(16, tn)

    # Prefer a tile that divides N exactly (avoids a wasted HBM pad pass); never shrink >2x.
    if N % 16 == 0 and N % tn != 0:
        for cand in range(tn, max(15, tn // 2 - 1), -16):
            if N % cand == 0:
                tn = cand
                break
    return int(tn), int(budget)


def _const_spec(shape):
    """Constant-index_map BlockSpec, single-buffered when pipeline_mode is supported."""
    idx = lambda i: (0, 0)
    buffered = getattr(pl, "Buffered", None)
    if buffered is not None:
        try:
            return pl.BlockSpec(shape, idx, pipeline_mode=buffered(1))
        except TypeError:
            pass
    return pl.BlockSpec(shape, idx)


def _make_kernel(Ep: int, H: int, D: int, compute_dtype, approx_recip: bool):
    """Single-tile cross-attention kernel operating on one (TN, Ep) row tile."""
    cd = jnp.dtype(compute_dtype)
    use_xlu_energy = (D % 128 == 0)     # lane-reduce on XLU when head_dim is lane-dense

    def kernel(bev_ref, qin_ref, wq_ref, wk_ref, wvs_ref, wo_ref, b_ref,
               hsel_ref, hselT_ref, dselT_ref, out_ref):
        f32 = jnp.float32
        bev = bev_ref[...].astype(cd)          # cast in-kernel (inputs streamed natively)
        qin = qin_ref[...].astype(cd)

        # Packed biases (f32): rows = [bq ; bk ; sum_h bv (width D, padded) ; bo].
        bq = b_ref[0:1, :]
        bk = b_ref[1:2, :]
        bvs = b_ref[2:3, :D]
        bo = b_ref[3:4, :]

        # Projections (MXU, f32 accumulation). V is pre-folded: vsum = bev @ Wv_sum + bvs.
        q = jnp.dot(qin, wq_ref[...], preferred_element_type=f32) + bq        # (TN, Ep)
        k = jnp.dot(bev, wk_ref[...], preferred_element_type=f32) + bk        # (TN, Ep)
        vsum = jnp.dot(bev, wvs_ref[...], preferred_element_type=f32) + bvs   # (TN, D)

        # energy[n, h] = sum_d q[n, h*D+d] * k[n, h*D+d]
        qk = q * k
        if use_xlu_energy:
            energy = jnp.sum(qk.reshape(qk.shape[0], H, D), axis=-1)          # XLU reduce
        else:
            energy = jnp.dot(qk.astype(cd), hsel_ref[...],
                             preferred_element_type=f32)                      # (TN, H)

        # softmax across the head axis (matches torch.softmax(energy, dim=-1)).
        m = jnp.max(energy, axis=-1, keepdims=True)
        p = jnp.exp(energy - m)
        denom = jnp.sum(p, axis=-1, keepdims=True)
        attn = p * pl.reciprocal(denom, approx=approx_recip)                  # (TN, H)

        # out_pre[n, h*D+d] = attn[n, h] * vsum[n, d]  (expand via selector transposes)
        attn_e = jnp.dot(attn.astype(cd), hselT_ref[...], preferred_element_type=f32)
        vsum_e = jnp.dot(vsum.astype(cd), dselT_ref[...], preferred_element_type=f32)
        out_pre = (attn_e * vsum_e).astype(cd)

        # Final projection.
        out_ref[...] = (jnp.dot(out_pre, wo_ref[...], preferred_element_type=f32)
                        + bo).astype(out_ref.dtype)

    return kernel


def prepare_cross_attention(params, *, num_heads: int, compute_dtype=jnp.bfloat16):
    """One-time weight packing (call once, reuse across forward calls).

    Returns (packed_arrays, meta) for cross_attention_apply.
    """
    wq, bq, wk, bk, wv, bv, wo, bo = params
    E = wq.shape[0]
    H = num_heads
    D = E // H
    assert D * H == E, "Embedding size must be divisible by number of heads"
    cd = jnp.dtype(compute_dtype)

    # Lane-dense padding of the embedding axis (only when needed).
    Ep = E if E % 128 == 0 else _round_up(E, 128)

    def pad_w(w):   # (E, E) -> (Ep, Ep), zeros elsewhere
        return jnp.pad(w, ((0, Ep - E), (0, Ep - E)))

    def pad_b(b):   # (1, E) -> (1, Ep)
        return jnp.pad(b, ((0, 0), (0, Ep - E)))

    wq_c = pad_w(wq).astype(cd)
    wk_c = pad_w(wk).astype(cd)
    # Folded V projection: Wv_sum[e, d] = sum_h Wv[e, h*D + d]   (E, D)
    wv_sum = wv.reshape(E, H, D).sum(axis=1)
    wvs_c = jnp.pad(wv_sum, ((0, Ep - E), (0, 0))).astype(cd)                 # (Ep, D)
    wo_c = pad_w(wo).astype(cd)

    # Packed biases: [bq ; bk ; sum_h bv (width D, padded to Ep) ; bo] -> (4, Ep) f32.
    bv_sum = bv.reshape(H, D).sum(axis=0)[None, :]                            # (1, D)
    b_all = jnp.concatenate(
        [pad_b(bq), pad_b(bk), jnp.pad(bv_sum, ((0, 0), (0, Ep - D))), pad_b(bo)],
        axis=0).astype(jnp.float32)

    # Hoisted selector constants (zero on padded lanes).
    e_idx = jnp.arange(Ep)
    valid = e_idx < E
    h_of_e = jnp.where(valid, e_idx // D, H)      # out-of-range marker for padded lanes
    d_of_e = jnp.where(valid, e_idx % D, D)
    head_sel = (h_of_e[:, None] == jnp.arange(H)[None, :]).astype(cd)         # (Ep, H)
    head_sel_t = (jnp.arange(H)[:, None] == h_of_e[None, :]).astype(cd)       # (H, Ep)
    dim_sel_t = (jnp.arange(D)[:, None] == d_of_e[None, :]).astype(cd)        # (D, Ep)

    packed = (wq_c, wk_c, wvs_c, wo_c, b_all, head_sel, head_sel_t, dim_sel_t)
    meta = CAMeta(E=E, Ep=Ep, H=H, D=D, cd_name=str(cd.name))
    return packed, meta


@functools.partial(jax.jit, static_argnames=("meta", "out_dtype"))
def cross_attention_apply(bev_emb, queries, packed, meta, *, out_dtype=None):
    """Pallas-backed CrossAttention.forward(bev_emb, queries, mask=None)."""
    E, Ep, H, D = meta.E, meta.Ep, meta.H, meta.D
    cd = jnp.dtype(meta.cd_name)
    N = queries.shape[0]
    assert queries.shape == (N, E) and bev_emb.shape == (N, E)

    wq_c, wk_c, wvs_c, wo_c, b_all, head_sel, head_sel_t, dim_sel_t = packed

    od = jnp.dtype(out_dtype) if out_dtype is not None else jnp.dtype(queries.dtype)
    in_bytes = max(jnp.dtype(bev_emb.dtype).itemsize, jnp.dtype(queries.dtype).itemsize)
    TN, vmem_limit = _pick_tile_n(N, Ep, H, D, in_bytes, cd.itemsize, od.itemsize)
    Np = _round_up(N, TN)

    # Streamed inputs in their NATIVE dtype (cast happens inside the kernel).
    bev_p, qin_p = bev_emb, queries
    if Ep != E or Np != N:
        bev_p = jnp.pad(bev_p, ((0, Np - N), (0, Ep - E)))
        qin_p = jnp.pad(qin_p, ((0, Np - N), (0, Ep - E)))

    grid = (Np // TN,)
    stream_spec = pl.BlockSpec((TN, Ep), lambda i: (i, 0))

    flops = 2 * Np * (3 * Ep * Ep + 2 * Ep * D + 2 * Ep * H)
    bytes_accessed = (2 * Np * Ep * in_bytes + Np * Ep * od.itemsize +
                      (3 * Ep * Ep + Ep * D + 3 * Ep * H + D * Ep) * cd.itemsize +
                      4 * Ep * 4)
    cost = pl.CostEstimate(flops=int(flops), transcendentals=int(Np * H),
                           bytes_accessed=int(bytes_accessed))

    out = pl.pallas_call(
        _make_kernel(Ep, H, D, cd, approx_recip=(cd != jnp.float32)),
        out_shape=jax.ShapeDtypeStruct((Np, Ep), od),
        grid=grid,
        in_specs=[
            stream_spec,                 # bev_emb  (streamed, pipelined)
            stream_spec,                 # queries  (streamed, pipelined)
            _const_spec((Ep, Ep)),       # Wq       (VMEM resident, single-buffered)
            _const_spec((Ep, Ep)),       # Wk
            _const_spec((Ep, D)),        # Wv_sum   (V projection folded over heads)
            _const_spec((Ep, Ep)),       # Wo
            _const_spec((4, Ep)),        # packed biases
            _const_spec((Ep, H)),        # head selector
            _const_spec((H, Ep)),        # head selector^T
            _const_spec((D, Ep)),        # dim selector^T
        ],
        out_specs=pl.BlockSpec((TN, Ep), lambda i: (i, 0)),
        compiler_params=pltpu.CompilerParams(
            dimension_semantics=("parallel",),        # megacore-shard rows on v7x
            vmem_limit_bytes=int(vmem_limit)),
        cost_estimate=cost,
    )(bev_p, qin_p, wq_c, wk_c, wvs_c, wo_c, b_all, head_sel, head_sel_t, dim_sel_t)

    if Np != N or Ep != E:
        out = out[:N, :E]
    return out


def cross_attention(bev_emb, queries, params, *, num_heads,
                    compute_dtype=jnp.bfloat16, out_dtype=None):
    """Convenience wrapper. For repeated calls, cache prepare_cross_attention()'s result."""
    packed, meta = prepare_cross_attention(params, num_heads=num_heads,
                                           compute_dtype=compute_dtype)
    return cross_attention_apply(bev_emb, queries, packed, meta, out_dtype=out_dtype)


def cross_attention_ref(bev_emb, queries, params, *, num_heads):
    """Pure-JAX f32 reference matching the PyTorch module semantics."""
    N, E = queries.shape
    H = num_heads
    D = E // H
    wq, bq, wk, bk, wv, bv, wo, bo = params

    q = queries @ wq + bq
    k = bev_emb @ wk + bk
    v = bev_emb @ wv + bv

    qh = q.reshape(N, H, D)
    kh = k.reshape(N, H, D)
    vh = v.reshape(N, H, D)

    energy = jnp.einsum("nhd,nhd->nh", qh, kh)                  # (N, H)
    attn = jax.nn.softmax(energy, axis=-1)                      # softmax over heads
    vsum = vh.sum(axis=1)                                       # (N, D)
    out_pre = (attn[:, :, None] * vsum[:, None, :]).reshape(N, E)
    return out_pre @ wo + bo


def init_params(key, embed_size):
    """Deterministic synthetic parameters for the four nn.Linear layers.

    Weights are stored as (in_features, out_features) so y = x @ W + b; biases are (1, E).
    """
    keys = jax.random.split(key, 8)
    scale = 1.0 / jnp.sqrt(embed_size)

    def lin(kw, kb):
        w = jax.random.uniform(kw, (embed_size, embed_size), jnp.float32, -scale, scale)
        b = jax.random.uniform(kb, (1, embed_size), jnp.float32, -scale, scale)
        return w, b

    wq, bq = lin(keys[0], keys[1])
    wk, bk = lin(keys[2], keys[3])
    wv, bv = lin(keys[4], keys[5])
    wo, bo = lin(keys[6], keys[7])
    return (wq, bq, wk, bk, wv, bv, wo, bo)


if __name__ == "__main__":
    N = 8            # batch (number of query tokens)
    EMBED = 32       # embed_size
    HEADS = 4        # num_heads -> head_dim = 8

    key = jax.random.PRNGKey(0)
    k_bev, k_q, k_p = jax.random.split(key, 3)

    bev_emb = jax.random.normal(k_bev, (N, EMBED), jnp.float32)
    queries = jax.random.normal(k_q, (N, EMBED), jnp.float32)
    params = init_params(k_p, EMBED)

    ref = cross_attention_ref(bev_emb, queries, params, num_heads=HEADS)

    # Exact f32 compute path: must match the reference to float32 precision.
    packed_f32, meta_f32 = prepare_cross_attention(params, num_heads=HEADS,
                                                   compute_dtype=jnp.float32)
    out_f32 = jax.block_until_ready(
        cross_attention_apply(bev_emb, queries, packed_f32, meta_f32))
    assert out_f32.shape == (N, EMBED) and out_f32.dtype == jnp.float32
    assert jnp.allclose(out_f32, ref, rtol=1e-5, atol=1e-5), (
        f"f32 max abs err = {jnp.max(jnp.abs(out_f32 - ref))}")

    # Fast bf16-matmul path (f32 accumulation): same semantics at bf16 matmul precision.
    packed_bf16, meta_bf16 = prepare_cross_attention(params, num_heads=HEADS,
                                                     compute_dtype=jnp.bfloat16)
    out_bf16 = jax.block_until_ready(
        cross_attention_apply(bev_emb, queries, packed_bf16, meta_bf16))
    assert out_bf16.shape == (N, EMBED)
    assert jnp.allclose(out_bf16, ref, rtol=1e-1, atol=1e-1), (
        f"bf16 max abs err = {jnp.max(jnp.abs(out_bf16.astype(jnp.float32) - ref))}")

    print("KERNEL_OK")
</pallas_src>

<mosaic_0001>
module attributes {stable_mosaic.version = 11 : i64} {
  func.func @kernel(%arg0: i32, %arg1: memref<16x128xf32, #tpu.memory_space<vmem>>, %arg2: memref<16x128xf32, #tpu.memory_space<vmem>>, %arg3: memref<128x128xf32, #tpu.memory_space<vmem>>, %arg4: memref<128x128xf32, #tpu.memory_space<vmem>>, %arg5: memref<128x8xf32, #tpu.memory_space<vmem>>, %arg6: memref<128x128xf32, #tpu.memory_space<vmem>>, %arg7: memref<4x128xf32, #tpu.memory_space<vmem>>, %arg8: memref<128x4xf32, #tpu.memory_space<vmem>>, %arg9: memref<4x128xf32, #tpu.memory_space<vmem>>, %arg10: memref<8x128xf32, #tpu.memory_space<vmem>>, %arg11: memref<16x128xf32, #tpu.memory_space<vmem>>) attributes {dimension_semantics = [#tpu.dimension_semantics<parallel>], iteration_bounds = array<i64: 1>, scalar_prefetch = 0 : i64, scratch_operands = 0 : i64, tpu.core_type = #tpu.core_type<tc>, window_params = [{transform_indices = @transform_0, window_bounds = array<i64: 16, 128>}, {transform_indices = @transform_1, window_bounds = array<i64: 16, 128>}, {pipeline_mode = #tpu.pipeline_mode<synchronous>, transform_indices = @transform_2, window_bounds = array<i64: 128, 128>}, {pipeline_mode = #tpu.pipeline_mode<synchronous>, transform_indices = @transform_3, window_bounds = array<i64: 128, 128>}, {pipeline_mode = #tpu.pipeline_mode<synchronous>, transform_indices = @transform_4, window_bounds = array<i64: 128, 8>}, {pipeline_mode = #tpu.pipeline_mode<synchronous>, transform_indices = @transform_5, window_bounds = array<i64: 128, 128>}, {pipeline_mode = #tpu.pipeline_mode<synchronous>, transform_indices = @transform_6, window_bounds = array<i64: 4, 128>}, {pipeline_mode = #tpu.pipeline_mode<synchronous>, transform_indices = @transform_7, window_bounds = array<i64: 128, 4>}, {pipeline_mode = #tpu.pipeline_mode<synchronous>, transform_indices = @transform_8, window_bounds = array<i64: 4, 128>}, {pipeline_mode = #tpu.pipeline_mode<synchronous>, transform_indices = @transform_9, window_bounds = array<i64: 8, 128>}, {transform_indices = @transform_10, window_bounds = array<i64: 16, 128>}]} {
    %c0 = arith.constant 0 : index
    %c0_0 = arith.constant 0 : index
    %0 = vector.load %arg1[%c0, %c0_0] : memref<16x128xf32, #tpu.memory_space<vmem>>, vector<16x128xf32>
    %c0_1 = arith.constant 0 : index
    %c0_2 = arith.constant 0 : index
    %1 = vector.load %arg2[%c0_1, %c0_2] : memref<16x128xf32, #tpu.memory_space<vmem>>, vector<16x128xf32>
    %c0_3 = arith.constant 0 : index
    %c0_4 = arith.constant 0 : index
    %2 = vector.load %arg7[%c0_3, %c0_4] : memref<4x128xf32, #tpu.memory_space<vmem>>, vector<1x128xf32>
    %c1 = arith.constant 1 : index
    %c0_5 = arith.constant 0 : index
    %3 = vector.load %arg7[%c1, %c0_5] : memref<4x128xf32, #tpu.memory_space<vmem>>, vector<1x128xf32>
    %c2 = arith.constant 2 : index
    %c0_6 = arith.constant 0 : index
    %4 = vector.load %arg7[%c2, %c0_6] : memref<4x128xf32, #tpu.memory_space<vmem>>, vector<1x8xf32>
    %c3 = arith.constant 3 : index
    %c0_7 = arith.constant 0 : index
    %5 = vector.load %arg7[%c3, %c0_7] : memref<4x128xf32, #tpu.memory_space<vmem>>, vector<1x128xf32>
    %c0_8 = arith.constant 0 : index
    %c0_9 = arith.constant 0 : index
    %6 = vector.load %arg3[%c0_8, %c0_9] : memref<128x128xf32, #tpu.memory_space<vmem>>, vector<128x128xf32>
    %cst = arith.constant dense<0.000000e+00> : vector<16x128xf32>
    %7 = tpu.matmul %1, %6, %cst {dimension_numbers = #tpu.dot_dimension_numbers<[1], [0], [0], [1], [0, 0, 1, 1], [], []>} : vector<16x128xf32>, vector<128x128xf32>, vector<16x128xf32> -> vector<16x128xf32>
    %8 = vector.broadcast %2 : vector<1x128xf32> to vector<16x128xf32>
    %9 = arith.addf %7, %8 : vector<16x128xf32>
    %c0_10 = arith.constant 0 : index
    %c0_11 = arith.constant 0 : index
    %10 = vector.load %arg4[%c0_10, %c0_11] : memref<128x128xf32, #tpu.memory_space<vmem>>, vector<128x128xf32>
    %cst_12 = arith.constant dense<0.000000e+00> : vector<16x128xf32>
    %11 = tpu.matmul %0, %10, %cst_12 {dimension_numbers = #tpu.dot_dimension_numbers<[1], [0], [0], [1], [0, 0, 1, 1], [], []>} : vector<16x128xf32>, vector<128x128xf32>, vector<16x128xf32> -> vector<16x128xf32>
    %12 = vector.broadcast %3 : vector<1x128xf32> to vector<16x128xf32>
    %13 = arith.addf %11, %12 : vector<16x128xf32>
    %c0_13 = arith.constant 0 : index
    %c0_14 = arith.constant 0 : index
    %14 = vector.load %arg5[%c0_13, %c0_14] : memref<128x8xf32, #tpu.memory_space<vmem>>, vector<128x8xf32>
    %cst_15 = arith.constant dense<0.000000e+00> : vector<16x8xf32>
    %15 = tpu.matmul %0, %14, %cst_15 {dimension_numbers = #tpu.dot_dimension_numbers<[1], [0], [0], [1], [0, 0, 1, 1], [], []>} : vector<16x128xf32>, vector<128x8xf32>, vector<16x8xf32> -> vector<16x8xf32>
    %16 = vector.broadcast %4 : vector<1x8xf32> to vector<16x8xf32>
    %17 = arith.addf %15, %16 : vector<16x8xf32>
    %18 = arith.mulf %9, %13 : vector<16x128xf32>
    %c0_16 = arith.constant 0 : index
    %c0_17 = arith.constant 0 : index
    %19 = vector.load %arg8[%c0_16, %c0_17] : memref<128x4xf32, #tpu.memory_space<vmem>>, vector<128x4xf32>
    %cst_18 = arith.constant dense<0.000000e+00> : vector<16x4xf32>
    %20 = tpu.matmul %18, %19, %cst_18 {dimension_numbers = #tpu.dot_dimension_numbers<[1], [0], [0], [1], [0, 0, 1, 1], [], []>} : vector<16x128xf32>, vector<128x4xf32>, vector<16x4xf32> -> vector<16x4xf32>
    %cst_19 = arith.constant dense<0xFF800000> : vector<16xf32>
    %21 = vector.multi_reduction <maximumf>, %20, %cst_19 [1] : vector<16x4xf32> to vector<16xf32>
    %22 = vector.shape_cast %21 : vector<16xf32> to vector<16x1xf32>
    %23 = vector.broadcast %22 : vector<16x1xf32> to vector<16x4xf32>
    %24 = arith.subf %20, %23 : vector<16x4xf32>
    %25 = math.exp %24 : vector<16x4xf32>
    %cst_20 = arith.constant dense<0.000000e+00> : vector<16xf32>
    %26 = vector.multi_reduction <add>, %25, %cst_20 [1] : vector<16x4xf32> to vector<16xf32>
    %27 = vector.shape_cast %26 : vector<16xf32> to vector<16x1xf32>
    %28 = tpu.reciprocal %27 : vector<16x1xf32> -> vector<16x1xf32>
    %29 = vector.broadcast %28 : vector<16x1xf32> to vector<16x4xf32>
    %30 = arith.mulf %25, %29 : vector<16x4xf32>
    %c0_21 = arith.constant 0 : index
    %c0_22 = arith.constant 0 : index
    %31 = vector.load %arg9[%c0_21, %c0_22] : memref<4x128xf32, #tpu.memory_space<vmem>>, vector<4x128xf32>
    %cst_23 = arith.constant dense<0.000000e+00> : vector<16x128xf32>
    %32 = tpu.matmul %30, %31, %cst_23 {dimension_numbers = #tpu.dot_dimension_numbers<[1], [0], [0], [1], [0, 0, 1, 1], [], []>} : vector<16x4xf32>, vector<4x128xf32>, vector<16x128xf32> -> vector<16x128xf32>
    %c0_24 = arith.constant 0 : index
    %c0_25 = arith.constant 0 : index
    %33 = vector.load %arg10[%c0_24, %c0_25] : memref<8x128xf32, #tpu.memory_space<vmem>>, vector<8x128xf32>
    %cst_26 = arith.constant dense<0.000000e+00> : vector<16x128xf32>
    %34 = tpu.matmul %17, %33, %cst_26 {dimension_numbers = #tpu.dot_dimension_numbers<[1], [0], [0], [1], [0, 0, 1, 1], [], []>} : vector<16x8xf32>, vector<8x128xf32>, vector<16x128xf32> -> vector<16x128xf32>
    %35 = arith.mulf %32, %34 : vector<16x128xf32>
    %c0_27 = arith.constant 0 : index
    %c0_28 = arith.constant 0 : index
    %36 = vector.load %arg6[%c0_27, %c0_28] : memref<128x128xf32, #tpu.memory_space<vmem>>, vector<128x128xf32>
    %cst_29 = arith.constant dense<0.000000e+00> : vector<16x128xf32>
    %37 = tpu.matmul %35, %36, %cst_29 {dimension_numbers = #tpu.dot_dimension_numbers<[1], [0], [0], [1], [0, 0, 1, 1], [], []>} : vector<16x128xf32>, vector<128x128xf32>, vector<16x128xf32> -> vector<16x128xf32>
    %38 = vector.broadcast %5 : vector<1x128xf32> to vector<16x128xf32>
    %39 = arith.addf %37, %38 : vector<16x128xf32>
    %c0_30 = arith.constant 0 : index
    %c0_31 = arith.constant 0 : index
    %40 = vector.load %arg11[%c0_30, %c0_31] : memref<16x128xf32, #tpu.memory_space<vmem>>, vector<16x128xf32>
    tpu.vector_store %arg11[%c0_30, %c0_31], %39 {strides = array<i32>} : memref<16x128xf32, #tpu.memory_space<vmem>>, vector<16x128xf32>,
    return
  }
  func.func @transform_0(%arg0: i32) -> (i32, i32) {
    %c0_i32 = arith.constant 0 : i32
    %c0_i32_0 = arith.constant 0 : i32
    return %arg0, %c0_i32 : i32, i32
  }
  func.func @transform_1(%arg0: i32) -> (i32, i32) {
    %c0_i32 = arith.constant 0 : i32
    %c0_i32_0 = arith.constant 0 : i32
    return %arg0, %c0_i32 : i32, i32
  }
  func.func @transform_2(%arg0: i32) -> (i32, i32) {
    %c0_i32 = arith.constant 0 : i32
    %c0_i32_0 = arith.constant 0 : i32
    %c0_i32_1 = arith.constant 0 : i32
    return %c0_i32, %c0_i32_0 : i32, i32
  }
  func.func @transform_3(%arg0: i32) -> (i32, i32) {
    %c0_i32 = arith.constant 0 : i32
    %c0_i32_0 = arith.constant 0 : i32
    %c0_i32_1 = arith.constant 0 : i32
    return %c0_i32, %c0_i32_0 : i32, i32
  }
  func.func @transform_4(%arg0: i32) -> (i32, i32) {
    %c0_i32 = arith.constant 0 : i32
    %c0_i32_0 = arith.constant 0 : i32
    %c0_i32_1 = arith.constant 0 : i32
    return %c0_i32, %c0_i32_0 : i32, i32
  }
  func.func @transform_5(%arg0: i32) -> (i32, i32) {
    %c0_i32 = arith.constant 0 : i32
    %c0_i32_0 = arith.constant 0 : i32
    %c0_i32_1 = arith.constant 0 : i32
    return %c0_i32, %c0_i32_0 : i32, i32
  }
  func.func @transform_6(%arg0: i32) -> (i32, i32) {
    %c0_i32 = arith.constant 0 : i32
    %c0_i32_0 = arith.constant 0 : i32
    %c0_i32_1 = arith.constant 0 : i32
    return %c0_i32, %c0_i32_0 : i32, i32
  }
  func.func @transform_7(%arg0: i32) -> (i32, i32) {
    %c0_i32 = arith.constant 0 : i32
    %c0_i32_0 = arith.constant 0 : i32
    %c0_i32_1 = arith.constant 0 : i32
    return %c0_i32, %c0_i32_0 : i32, i32
  }
  func.func @transform_8(%arg0: i32) -> (i32, i32) {
    %c0_i32 = arith.constant 0 : i32
    %c0_i32_0 = arith.constant 0 : i32
    %c0_i32_1 = arith.constant 0 : i32
    return %c0_i32, %c0_i32_0 : i32, i32
  }
  func.func @transform_9(%arg0: i32) -> (i32, i32) {
    %c0_i32 = arith.constant 0 : i32
    %c0_i32_0 = arith.constant 0 : i32
    %c0_i32_1 = arith.constant 0 : i32
    return %c0_i32, %c0_i32_0 : i32, i32
  }
  func.func @transform_10(%arg0: i32) -> (i32, i32) {
    %c0_i32 = arith.constant 0 : i32
    %c0_i32_0 = arith.constant 0 : i32
    return %arg0, %c0_i32 : i32, i32
  }
}

</mosaic_0001>

<bundles_post_ra>
// kernel: cross_attention_apply.1
= control target key start
LH: loop header
LB: loop body
LE: loop exit
PB: predicated region body
PF: predicated region fallthrough
CT: control target
= control target key end

     0   :  { %15 = vsyncpa [#allocation3], 0  ;;  %s1216_s13 = smov [#allocation2]   ;;  %s1524_s0 = inlined_call_operand.vmem [shape: f32[16,128], index: 0, kind: input, shape index: {}]   ;;  %s1525_s1 = inlined_call_operand.vmem [shape: f32[16,128], index: 1, kind: input, shape index: {}]   ;;  %s1526_s2 = inlined_call_operand.vmem [shape: f32[128,128], index: 2, kind: input, shape index: {}]   ;;  %s1527_s3 = inlined_call_operand.vmem [shape: f32[128,128], index: 3, kind: input, shape index: {}]   ;;  %s1528_s4 = inlined_call_operand.vmem [shape: f32[128,8], index: 4, kind: input, shape index: {}]   ;;  %s1529_s5 = inlined_call_operand.hbm [shape: f32[128,128], index: 5, kind: input, shape index: {}]   ;;  %s1530_s6 = inlined_call_operand.vmem [shape: f32[4,128], index: 6, kind: input, shape index: {}]   ;;  %s1531_s7 = inlined_call_operand.vmem [shape: f32[128,4], index: 7, kind: input, shape index: {}]   ;;  %s1532_s8 = inlined_call_operand.vmem [shape: f32[4,128], index: 8, kind: input, shape index: {}]   ;;  %s1533_s9 = inlined_call_operand.vmem [shape: f32[8,128], index: 9, kind: input, shape index: {}]   ;;  %s1534_s10 = inlined_call_operand.vmem [shape: f32[16,128], index: 10, kind: output, shape index: {}]  }
   0x1   :  { %s31_s14 = sshll.u32 %s1216_s13, 4  ;;  %s1192_s17 = scalar_lea.hbm %s1529_s5, 2048  ;;  %s32_s14 = int_to_ptr.vmem [resolvable:$true] %s31_s14 }
   0x2   :  { %p1193_p0 = scmp.ne.s32.totalorder %s1529_s5, %s1192_s17  ;;  %p1196_p1 = scmp.lt.u32.totalorder %s1192_s17, %s1529_s5 }
   0x4   :  { %p1198_p2 = pnand %p1196_p1, %p1193_p0 }
   0x6   :  { %1201 = shalt.err (!%p1198_p2)
}
   0x7   :  { %s1202_s22 = scalar_lea.vmem %s32_s14, 2048  ;;  %p1207_p4 = scmp.lt.s32.totalorder %s32_s14, %s32_s14 }
   0x8   :  { %p1203_p3 = scmp.ne.s32.totalorder %s32_s14, %s1202_s22  ;;  %p1208_p5 = scmp.lt.s32.totalorder %s1202_s22, %s1202_s22 }
   0xa   :  { %p1209_p6 = por %p1208_p5, %p1207_p4 }
   0xc   :  { %p1210_p7 = pnand %p1209_p6, %p1203_p3 }
   0xe   :  { %1213 = shalt.err (!%p1210_p7)
}
   0xf   :  { %s1217_s23 = smov 128   ;;  %s1218_s24 = smov 8  }
  0x10   :  { %37 = dma.hbm_to_vmem [thread:$0]  %s1529_s5, 2048, %s32_s14, [#allocation3], %s1217_s23, %s1217_s23, %s1218_s24  }
  0x11   :  { %1214 = dma.done.wait [#allocation3], 2048  }
  0x12   :  { %1215 = vsyncadd [#allocation3], 4294965248  ;;  %v57_v0 = vld [vmem:[%s1526_s2] sm:$0xff]  ;;  %v58_v1 = vld [vmem:[%s1526_s2 + $0x8] sm:$0xff]  ;;  %vm435_vm0 = vcmask 31744   ;;  %vm465_vm1 = vcmask 1043456  }
  0x13   :  { %v152_v2 = vld [vmem:[%s1527_s3] sm:$0xff]  ;;  %v1021_v3 = vpack.c.bf16 %v58_v1, %v57_v0  ;;  %v153_v4 = vld [vmem:[%s1527_s3 + $0x8] sm:$0xff]  ;;  %v59_v5 = vld [vmem:[%s1526_s2 + $0x10] sm:$0xff]  ;;  %vm545_vm2 = vcmask 64512  }
  0x14   :  { %v60_v6 = vld [vmem:[%s1526_s2 + $0x18] sm:$0xff]  ;;  %v1053_v7 = vpack.c.bf16 %v153_v4, %v152_v2  ;;  %v154_v9 = vld [vmem:[%s1527_s3 + $0x10] sm:$0xff]  ;;  %v61_v11 = vld [vmem:[%s1526_s2 + $0x20] sm:$0xff] }
  0x15   :  { %v1025_v8 = vpack.c.bf16 %v60_v6, %v59_v5  ;;  %v155_v10 = vld [vmem:[%s1527_s3 + $0x18] sm:$0xff]  ;;  %1022 = vmatprep.subr.bf16.mxu0 %v1021_v3  ;;  %v62_v13 = vld [vmem:[%s1526_s2 + $0x28] sm:$0xff]  ;;  %v156_v14 = vld [vmem:[%s1527_s3 + $0x20] sm:$0xff] }
  0x16   :  { %v1057_v12 = vpack.c.bf16 %v155_v10, %v154_v9  ;;  %v157_v15 = vld [vmem:[%s1527_s3 + $0x28] sm:$0xff]  ;;  %1054 = vmatprep.subr.bf16.mxu1 %v1053_v7  ;;  %1024 = vmatpush3.bf16.msra.mxu0 %v1021_v3  ;;  %v1029_v16 = vpack.c.bf16 %v62_v13, %v61_v11  ;;  %v63_v18 = vld [vmem:[%s1526_s2 + $0x30] sm:$0xff]  ;;  %v64_v19 = vld [vmem:[%s1526_s2 + $0x38] sm:$0xff] }
  0x17   :  { %1056 = vmatpush3.bf16.msra.mxu1 %v1053_v7  ;;  %1026 = vmatprep.subr.bf16.mxu0 %v1025_v8  ;;  %v1061_v17 = vpack.c.bf16 %v157_v15, %v156_v14  ;;  %v158_v20 = vld [vmem:[%s1527_s3 + $0x30] sm:$0xff]  ;;  %v159_v21 = vld [vmem:[%s1527_s3 + $0x38] sm:$0xff]  ;;  %v1033_v22 = vpack.c.bf16 %v64_v19, %v63_v18  ;;  %v65_v24 = vld [vmem:[%s1526_s2 + $0x40] sm:$0xff] }
  0x18   :  { %1058 = vmatprep.subr.bf16.mxu1 %v1057_v12  ;;  %v1065_v23 = vpack.c.bf16 %v159_v21, %v158_v20  ;;  %v66_v25 = vld [vmem:[%s1526_s2 + $0x48] sm:$0xff]  ;;  %v51_v26 = vld [vmem:[%s1525_s1] sm:$0xff]  ;;  %v67_v32 = vld [vmem:[%s1526_s2 + $0x50] sm:$0xff] }
  0x19   :  { %v160_v27 = vld [vmem:[%s1527_s3 + $0x40] sm:$0xff]  ;;  %v161_v28 = vld [vmem:[%s1527_s3 + $0x48] sm:$0xff]  ;;  %868 = vmatprep.mubr.f32.mxu0 %v51_v26  ;;  %v1037_v30 = vpack.c.bf16 %v66_v25, %v65_v24  ;;  %v68_v33 = vld [vmem:[%s1526_s2 + $0x58] sm:$0xff] }
  0x1a   :  { %1028 = vmatpush3.bf16.msra.mxu0 %v1025_v8  ;;  %v49_v29 = vld [vmem:[%s1524_s0] sm:$0xff]  ;;  %v1069_v31 = vpack.c.bf16 %v161_v28, %v160_v27  ;;  %v162_v34 = vld [vmem:[%s1527_s3 + $0x50] sm:$0xff]  ;;  %v163_v35 = vld [vmem:[%s1527_s3 + $0x58] sm:$0xff]  ;;  %v1041_v36 = vpack.c.bf16 %v68_v33, %v67_v32 }
  0x1b   :  { %1060 = vmatpush3.bf16.msra.mxu1 %v1057_v12  ;;  %1030 = vmatprep.subr.bf16.mxu0 %v1029_v16  ;;  %v1073_v37 = vpack.c.bf16 %v163_v35, %v162_v34  ;;  %v69_v38 = vld [vmem:[%s1526_s2 + $0x60] sm:$0xff]  ;;  %v70_v39 = vld [vmem:[%s1526_s2 + $0x68] sm:$0xff]  ;;  %v71_v44 = vld [vmem:[%s1526_s2 + $0x70] sm:$0xff] }
  0x1c   :  { %1062 = vmatprep.subr.bf16.mxu1 %v1061_v17  ;;  %903 = vmatprep.mubr.f32.mxu1 %v49_v29  ;;  %v164_v40 = vld [vmem:[%s1527_s3 + $0x60] sm:$0xff]  ;;  %v165_v41 = vld [vmem:[%s1527_s3 + $0x68] sm:$0xff]  ;;  %v1045_v42 = vpack.c.bf16 %v70_v39, %v69_v38  ;;  %v72_v45 = vld [vmem:[%s1526_s2 + $0x78] sm:$0xff] }
  0x1d   :  { %v1077_v43 = vpack.c.bf16 %v165_v41, %v164_v40  ;;  %v166_v46 = vld [vmem:[%s1527_s3 + $0x70] sm:$0xff]  ;;  %v167_v47 = vld [vmem:[%s1527_s3 + $0x78] sm:$0xff]  ;;  %v1049_v48 = vpack.c.bf16 %v72_v45, %v71_v44  ;;  %v344_v50 = vld [vmem:[%s1531_s7] sm:$0xff] }
  0x1e   :  { %1032 = vmatpush3.bf16.msra.mxu0 %v1029_v16  ;;  %v1081_v49 = vpack.c.bf16 %v167_v47, %v166_v46  ;;  %v345_v51 = vld [vmem:[%s1531_s7 + $0x8] sm:$0xff]  ;;  %v346_v53 = vld [vmem:[%s1531_s7 + $0x10] sm:$0xff]  ;;  %v347_v54 = vld [vmem:[%s1531_s7 + $0x18] sm:$0xff] }
  0x1f   :  { %1064 = vmatpush3.bf16.msra.mxu1 %v1061_v17  ;;  %1034 = vmatprep.subr.bf16.mxu0 %v1033_v22  ;;  %v1117_v52 = vpack.c.bf16 %v345_v51, %v344_v50  ;;  %v52_v55 = vld [vmem:[%s1525_s1 + $0x8] sm:$0xff]  ;;  %v1121_v57 = vpack.c.bf16 %v347_v54, %v346_v53  ;;  %v348_v58 = vld [vmem:[%s1531_s7 + $0x20] sm:$0xff]  ;;  %v350_v61 = vld [vmem:[%s1531_s7 + $0x30] sm:$0xff] }
  0x20   :  { %1066 = vmatprep.subr.bf16.mxu1 %v1065_v23  ;;  %v1406_v56 = vld [vmem:[%s1524_s0 + $0x8] sm:$0xff]  ;;  %v351_v62 = vld [vmem:[%s1531_s7 + $0x38] sm:$0xff]  ;;  %v352_v0 = vld [vmem:[%s1531_s7 + $0x40] sm:$0xff] }
  0x21   :  { %v349_v59 = vld [vmem:[%s1531_s7 + $0x28] sm:$0xff]  ;;  %v1129_v63 = vpack.c.bf16 %v351_v62, %v350_v61  ;;  %v354_v3 = vld [vmem:[%s1531_s7 + $0x50] sm:$0xff]  ;;  %v355_v4 = vld [vmem:[%s1531_s7 + $0x58] sm:$0xff] }
  0x22   :  { %1036 = vmatpush3.bf16.msra.mxu0 %v1033_v22  ;;  %v1125_v60 = vpack.c.bf16 %v349_v59, %v348_v58  ;;  %v353_v1 = vld [vmem:[%s1531_s7 + $0x48] sm:$0xff]  ;;  %v1137_v5 = vpack.c.bf16 %v355_v4, %v354_v3  ;;  %v356_v6 = vld [vmem:[%s1531_s7 + $0x60] sm:$0xff]  ;;  %v358_v9 = vld [vmem:[%s1531_s7 + $0x70] sm:$0xff] }
  0x23   :  { %1068 = vmatpush3.bf16.msra.mxu1 %v1065_v23  ;;  %1038 = vmatprep.subr.bf16.mxu0 %v1037_v30  ;;  %v1133_v2 = vpack.c.bf16 %v353_v1, %v352_v0  ;;  %v357_v7 = vld [vmem:[%s1531_s7 + $0x68] sm:$0xff]  ;;  %v359_v10 = vld [vmem:[%s1531_s7 + $0x78] sm:$0xff]  ;;  %v731_v12 = vld [vmem:[%s1530_s6] ss:$0 sm:$0xff] }
  0x24   :  { %1070 = vmatprep.subr.bf16.mxu1 %v1069_v31  ;;  %v1141_v8 = vpack.c.bf16 %v357_v7, %v356_v6  ;;  %v1145_v11 = vpack.c.bf16 %v359_v10, %v358_v9  ;;  %v732_v13 = vld [vmem:[%s1530_s6 + $0x1] ss:$0 sm:$0xff]  ;;  %v248_v25 = vld [vmem:[%s1528_s4 + $0x8] sm:$0xff]  ;;  %v249_v26 = vld [vmem:[%s1528_s4 + $0x10] sm:$0xff] }
  0x25   :  { %v247_v24 = vld [vmem:[%s1528_s4] sm:$0xff]  ;;  %v250_v28 = vld [vmem:[%s1528_s4 + $0x18] sm:$0xff]  ;;  %v253_v33 = vld [vmem:[%s1528_s4 + $0x30] sm:$0xff] }
  0x26   :  { %1040 = vmatpush3.bf16.msra.mxu0 %v1037_v30  ;;  %v1085_v27 = vpack.c.bf16 %v248_v25, %v247_v24  ;;  %v251_v30 = vld [vmem:[%s1528_s4 + $0x20] sm:$0xff]  ;;  %v254_v34 = vld [vmem:[%s1528_s4 + $0x38] sm:$0xff]  ;;  %v257_v39 = vld [vmem:[%s1528_s4 + $0x50] sm:$0xff] }
  0x27   :  { %1072 = vmatpush3.bf16.msra.mxu1 %v1069_v31  ;;  %1042 = vmatprep.subr.bf16.mxu0 %v1041_v36  ;;  %v252_v31 = vld [vmem:[%s1528_s4 + $0x28] sm:$0xff]  ;;  %v1097_v35 = vpack.c.bf16 %v254_v34, %v253_v33  ;;  %v258_v40 = vld [vmem:[%s1528_s4 + $0x58] sm:$0xff]  ;;  %v261_v45 = vld [vmem:[%s1528_s4 + $0x70] sm:$0xff] }
  0x28   :  { %1074 = vmatprep.subr.bf16.mxu1 %v1073_v37  ;;  %v1093_v32 = vpack.c.bf16 %v252_v31, %v251_v30  ;;  %v1105_v41 = vpack.c.bf16 %v258_v40, %v257_v39  ;;  %v262_v46 = vld [vmem:[%s1528_s4 + $0x78] sm:$0xff]  ;;  %v458_v62 = vld [vmem:[%s1532_s8] sm:$0xf]  ;;  %v632_v6 = vld [vmem:[#allocation2 + $0x18] sm:$0xff] }
  0x29   :  { %v1113_v47 = vpack.c.bf16 %v262_v46, %v261_v45  ;;  %v544_v0 = vld [vmem:[%s1533_s9] sm:$0xff]  ;;  %v630_v3 = vld [vmem:[#allocation2 + $0x8] sm:$0xff]  ;;  %v644_v33 = vld [vmem:[#allocation2 + $0x78] sm:$0xff] }
  0x2a   :  { %1044 = vmatpush3.bf16.msra.mxu0 %v1041_v36  ;;  %v255_v36 = vld [vmem:[%s1528_s4 + $0x40] sm:$0xff]  ;;  %v634_v9 = vld [vmem:[#allocation2 + $0x28] sm:$0xff] }
  0x2b   :  { %1076 = vmatpush3.bf16.msra.mxu1 %v1073_v37  ;;  %1046 = vmatprep.subr.bf16.mxu0 %v1045_v42  ;;  %v256_v37 = vld [vmem:[%s1528_s4 + $0x48] sm:$0xff]  ;;  %v631_v4 = vld [vmem:[#allocation2 + $0x10] sm:$0xff]  ;;  %v642_v30 = vld [vmem:[#allocation2 + $0x68] sm:$0xff] }
  0x2c   :  { %1078 = vmatprep.subr.bf16.mxu1 %v1077_v43  ;;  %v1101_v38 = vpack.c.bf16 %v256_v37, %v255_v36  ;;  %v1153_v7 = vpack.c.bf16 %v632_v6, %v631_v4  ;;  %v733_v24 = vld [vmem:[%s1530_s6 + $0x2] ss:$0 sm:$0xff] }
  0x2e   :  { %1048 = vmatpush3.bf16.msra.mxu0 %v1045_v42  ;;  %v259_v42 = vld [vmem:[%s1528_s4 + $0x60] sm:$0xff] }
  0x2f   :  { %1080 = vmatpush3.bf16.msra.mxu1 %v1077_v43  ;;  %1050 = vmatprep.subr.bf16.mxu0 %v1049_v48  ;;  %v260_v43 = vld [vmem:[%s1528_s4 + $0x68] sm:$0xff] }
  0x30   :  { %1082 = vmatprep.subr.bf16.mxu1 %v1081_v49  ;;  %v1109_v44 = vpack.c.bf16 %v260_v43, %v259_v42 }
  0x32   :  { %1052 = vmatpush3.bf16.msra.mxu0 %v1049_v48 }
  0x33   :  { %1084 = vmatpush3.bf16.msra.mxu1 %v1081_v49  ;;  %1086 = vmatprep.subr.bf16.mxu0 %v1085_v27 }
  0x34   :  { %1118 = vmatprep.subr.bf16.mxu1 %v1117_v52 }
  0x35   :  { %869 = vmatmul.mubr.f32.vlgmr.msra.gmra.mrb[0].mxu0 %v52_v55 }
  0x36   :  { %904 = vmatmul.mubr.f32.vlgmr.msra.gmra.mrb[0].mxu1 %v1406_v56  ;;  %938 = vmatprep.mubr.f32.mxu0 %v49_v29  ;;  %v1089_v29 = vpack.c.bf16 %v250_v28, %v249_v26 }
  0x37   :  { %1120 = vmatpush3.bf16.msra.mxu1 %v1117_v52  ;;  %1088 = vmatpush3.bf16.msra.mxu0 %v1085_v27 }
  0x38   :  { %1122 = vmatprep.subr.bf16.mxu1 %v1121_v57  ;;  %1090 = vmatprep.subr.bf16.mxu0 %v1089_v29 }
  0x3b   :  { %1124 = vmatpush3.bf16.msra.mxu1 %v1121_v57  ;;  %1092 = vmatpush3.bf16.msra.mxu0 %v1089_v29  ;;  %v641_v29 = vld [vmem:[#allocation2 + $0x60] sm:$0xff] }
  0x3c   :  { %1126 = vmatprep.subr.bf16.mxu1 %v1125_v60  ;;  %1094 = vmatprep.subr.bf16.mxu0 %v1093_v32  ;;  %v1173_v31 = vpack.c.bf16 %v642_v30, %v641_v29 }
  0x3f   :  { %1128 = vmatpush3.bf16.msra.mxu1 %v1125_v60  ;;  %1096 = vmatpush3.bf16.msra.mxu0 %v1093_v32  ;;  %v643_v32 = vld [vmem:[#allocation2 + $0x70] sm:$0xff] }
  0x40   :  { %1130 = vmatprep.subr.bf16.mxu1 %v1129_v63  ;;  %1098 = vmatprep.subr.bf16.mxu0 %v1097_v35  ;;  %v1177_v34 = vpack.c.bf16 %v644_v33, %v643_v32 }
  0x43   :  { %1132 = vmatpush3.bf16.msra.mxu1 %v1129_v63  ;;  %1100 = vmatpush3.bf16.msra.mxu0 %v1097_v35 }
  0x44   :  { %1134 = vmatprep.subr.bf16.mxu1 %v1133_v2  ;;  %1102 = vmatprep.subr.bf16.mxu0 %v1101_v38 }
  0x47   :  { %1136 = vmatpush3.bf16.msra.mxu1 %v1133_v2  ;;  %1104 = vmatpush3.bf16.msra.mxu0 %v1101_v38  ;;  %v629_v2 = vld [vmem:[#allocation2] sm:$0xff] }
  0x48   :  { %1138 = vmatprep.subr.bf16.mxu1 %v1137_v5  ;;  %1106 = vmatprep.subr.bf16.mxu0 %v1105_v41 }
  0x4b   :  { %1140 = vmatpush3.bf16.msra.mxu1 %v1137_v5  ;;  %1108 = vmatpush3.bf16.msra.mxu0 %v1105_v41  ;;  %v1149_v5 = vpack.c.bf16 %v630_v3, %v629_v2  ;;  %v739_v41 = vld [vmem:[%s1530_s6 + $0x3] ss:$0 sm:$0xff] }
  0x4c   :  { %1142 = vmatprep.subr.bf16.mxu1 %v1141_v8  ;;  %1110 = vmatprep.subr.bf16.mxu0 %v1109_v44 }
  0x4f   :  { %1144 = vmatpush3.bf16.msra.mxu1 %v1141_v8  ;;  %1112 = vmatpush3.bf16.msra.mxu0 %v1109_v44  ;;  %v633_v8 = vld [vmem:[#allocation2 + $0x20] sm:$0xff] }
  0x50   :  { %1146 = vmatprep.subr.bf16.mxu1 %v1145_v11  ;;  %1114 = vmatprep.subr.bf16.mxu0 %v1113_v47  ;;  %v1157_v10 = vpack.c.bf16 %v634_v9, %v633_v8 }
  0x53   :  { %1148 = vmatpush3.bf16.msra.mxu1 %v1145_v11  ;;  %1116 = vmatpush3.bf16.msra.mxu0 %v1113_v47  ;;  %v635_v11 = vld [vmem:[#allocation2 + $0x30] sm:$0xff] }
  0x54   :  { %976 = vmatprep.subr.msk.mxu1 %vm465_vm1, %v458_v62  ;;  %1150 = vmatprep.subr.bf16.mxu0 %v1149_v5 }
  0x56   :  { %939 = vmatmul.mubr.f32.vlgmr.msra.gmra.mrb[2].mxu0 %v1406_v56 }
  0x57   :  { %1152 = vmatpush3.bf16.msra.mxu0 %v1149_v5 }
  0x58   :  { %1154 = vmatprep.subr.bf16.mxu0 %v1153_v7 }
  0x5b   :  { %1156 = vmatpush3.bf16.msra.mxu0 %v1153_v7 }
  0x5c   :  { %1158 = vmatprep.subr.bf16.mxu0 %v1157_v10 }
  0x5f   :  { %1160 = vmatpush3.bf16.msra.mxu0 %v1157_v10 }
 0x108   :  { %v870_v14 = vpop.f32.mrb[0].mxu0 }
 0x109   :  { %v149_v15 = vadd.f32 %v870_v14, %v731_v12  ;;  %v905_v16 = vpop.f32.mrb[0].mxu1  ;;  %v143_v17 = vpop.f32.mrb[1].mxu0  ;;  %v637_v14 = vld [vmem:[#allocation2 + $0x40] sm:$0xff] }
 0x10a   :  { %v244_v18 = vadd.f32 %v905_v16, %v732_v13  ;;  %v144_v19 = vadd.f32 %v731_v12, %v143_v17  ;;  %v238_v20 = vpop.f32.mrb[1].mxu1  ;;  %v636_v12 = vld [vmem:[#allocation2 + $0x38] sm:$0xff]  ;;  %v639_v17 = vld [vmem:[#allocation2 + $0x50] sm:$0xff] }
 0x10b   :  { %v239_v21 = vadd.f32 %v732_v13, %v238_v20  ;;  %v1161_v13 = vpack.c.bf16 %v636_v12, %v635_v11 }
 0x10c   :  { %v343_v22 = vmul.f32 %v244_v18, %v149_v15  ;;  %v638_v15 = vld [vmem:[#allocation2 + $0x48] sm:$0xff]  ;;  %v640_v18 = vld [vmem:[#allocation2 + $0x58] sm:$0xff] }
 0x10d   :  { %v342_v23 = vmul.f32 %v239_v21, %v144_v19  ;;  %1162 = vmatprep.subr.bf16.mxu0 %v1161_v13  ;;  %v1165_v16 = vpack.c.bf16 %v638_v15, %v637_v14  ;;  %v1169_v19 = vpack.c.bf16 %v640_v18, %v639_v17 }
 0x10e   :  { %1164 = vmatpush3.bf16.msra.mxu0 %v1161_v13 }
 0x10f   :  { %973 = vmatprep.mubr.f32.mxu1 %v342_v23  ;;  %1166 = vmatprep.subr.bf16.mxu0 %v1165_v16 }
 0x110   :  { %974 = vmatmul.mubr.f32.vlgmr.msra.gmra.mrb[2].mxu1 %v343_v22 }
 0x111   :  { %977 = vmatpush3.msk.msra.mxu1 %vm465_vm1, %v458_v62 }
 0x112   :  { %981 = vmatprep.subr.mxu1 %v544_v0  ;;  %1168 = vmatpush3.bf16.msra.mxu0 %v1165_v16 }
 0x113   :  { %1170 = vmatprep.subr.bf16.mxu0 %v1169_v19 }
 0x116   :  { %1172 = vmatpush3.bf16.msra.mxu0 %v1169_v19 }
 0x117   :  { %1174 = vmatprep.subr.bf16.mxu0 %v1173_v31 }
 0x11a   :  { %1176 = vmatpush3.bf16.msra.mxu0 %v1173_v31 }
 0x11b   :  { %1178 = vmatprep.subr.bf16.mxu0 %v1177_v34 }
 0x11e   :  { %1180 = vmatpush3.bf16.msra.mxu0 %v1177_v34 }
 0x129   :  { %v940_v63 = vpop.f32.mrb[2].mxu0 }
 0x12a   :  { %v333_v1 = vpop.f32.mrb[3].mxu0  ;;  %v339_v28 = vadd.f32 %v940_v63, %v733_v24 }
 0x12b   :  { %v334_v26 = vadd.f32 %v733_v24, %v333_v1 }
 0x1e3   :  { %v975_v48 = vpop.f32.mrb[2].mxu1 }
 0x1e4   :  { %v426_v49 = vpop.f32.mrb[3].mxu1  ;;  %v439_v51 = vsel %vm435_vm0, %v975_v48, -inf }
 0x1e5   :  { %v436_v50 = vsel %vm435_vm0, %v426_v49, -inf }
 0x1e6   :  { %437 = vmax.xlane.f32.xlu0 %v436_v50 }
 0x1ea   :  { %440 = vmax.xlane.f32.xlu0 %v439_v51 }
 0x273   :  { %v438_v52 = vpop.xlane.xlu0 %437 }
 0x274   :  { %v442_v53 = vsub.f32 %v426_v49, %v438_v52 }
 0x276   :  { %v444_v54 = vmul.f32 1.442695, %v442_v53 }
 0x277   :  { %v441_v55 = vpop.xlane.xlu0 %440 }
 0x278   :  { %1184 = vpow2.f32 %v444_v54  ;;  %v443_v57 = vsub.f32 %v975_v48, %v441_v55 }
 0x27a   :  { %v446_v58 = vmul.f32 1.442695, %v443_v57 }
 0x27c   :  { %1186 = vpow2.f32 %v446_v58 }
 0x282   :  { %v1185_v59 = vpop.eup %1184 }
 0x283   :  { %v448_v56 = vsel %vm435_vm0, %v1185_v59, 0.0 }
 0x284   :  { %449 = vadd.xlane.f32.xlu1 %v448_v56 }
 0x286   :  { %v1187_v60 = vpop.eup %1186 }
 0x287   :  { %v451_v61 = vsel %vm435_vm0, %v1187_v60, 0.0 }
 0x288   :  { %452 = vadd.xlane.f32.xlu1 %v451_v61 }
 0x311   :  { %v450_v20 = vpop.xlane.xlu1 %449 }
 0x312   :  { %1188 = vrcp.f32 %v450_v20 }
 0x315   :  { %v453_v21 = vpop.xlane.xlu1 %452 }
 0x316   :  { %1190 = vrcp.f32 %v453_v21 }
 0x31c   :  { %v1189_v22 = vpop.eup %1188 }
 0x31d   :  { %v456_v23 = vmul.f32 %v1189_v22, %v1185_v59 }
 0x31f   :  { %978 = vmatprep.mubr.msk.f32.mxu1 %vm435_vm0, %v456_v23 }
 0x320   :  { %v1191_v25 = vpop.eup %1190 }
 0x321   :  { %v457_v27 = vmul.f32 %v1191_v25, %v1187_v60 }
 0x323   :  { %979 = vmatmul.mubr.msk.f32.vlgmr.msra.gmra.mrb[4].mxu1 %vm435_vm0, %v457_v27 }
 0x324   :  { %982 = vmatpush3.msra.mxu1 %v544_v0  ;;  %983 = vmatprep.mubr.msk.f32.mxu1 %vm545_vm2, %v334_v26 }
 0x327   :  { %984 = vmatmul.mubr.msk.f32.vlgmr.msra.gmra.mrb[6].mxu1 %vm545_vm2, %v339_v28 }
 0x3f6   :  { %v980_v35 = vpop.f32.mrb[4].mxu1 }
 0x3f7   :  { %v535_v36 = vpop.f32.mrb[5].mxu1 }
 0x3fa   :  { %v985_v37 = vpop.f32.mrb[6].mxu1 }
 0x3fb   :  { %v628_v38 = vmul.f32 %v985_v37, %v980_v35  ;;  %v618_v39 = vpop.f32.mrb[7].mxu1 }
 0x3fc   :  { %v627_v40 = vmul.f32 %v618_v39, %v535_v36 }
 0x3fe   :  { %1018 = vmatprep.mubr.f32.mxu0 %v627_v40 }
 0x3ff   :  { %1019 = vmatmul.mubr.f32.vlgmr.msra.gmra.mrb[4].mxu0 %v628_v38 }
 0x4d2   :  { %v1020_v42 = vpop.f32.mrb[4].mxu0 }
 0x4d3   :  { %v721_v43 = vadd.f32 %v1020_v42, %v739_v41  ;;  %v715_v44 = vpop.f32.mrb[5].mxu0 }
 0x4d4   :  { %v716_v45 = vadd.f32 %v739_v41, %v715_v44 }
 0x4d5   :  { %725 = vst [vmem:[%s1534_s10 + $0x8] sm:$0xff] %v721_v43 }
 0x4d6   :  { %724 = vst [vmem:[%s1534_s10] sm:$0xff] %v716_v45 }
 0x4d7   :  { %730 = vsyncpa [#allocation3], 1 }

</bundles_post_ra>
